<compile_context>
chip_gen: v7x
topology: tpu7x:2x2x1
jax: 0.10.0
libtpu: 0.0.40
codegen_flags: <defaults>
</compile_context>

<pallas_src>
import functools
import math

import jax
import jax.numpy as jnp
from jax.experimental import pallas as pl
from jax.experimental.pallas import tpu as pltpu

_VMEM_LIMIT = 48 * 1024 * 1024     # fits v7x's 64 MiB VMEM with headroom
_TILE_M_MAX = 512                  # M-tile for matmul-style kernels


def _compiler(n_axes=1):
    return pltpu.CompilerParams(
        dimension_semantics=("parallel",) * n_axes,
        vmem_limit_bytes=_VMEM_LIMIT,
    )


def _round_up(x, m):
    return ((x + m - 1) // m) * m


def _tile_m(m):
    return min(_TILE_M_MAX, max(8, _round_up(m, 8)))


# ----------------------------- Pallas kernels -----------------------------

def _mm_bn_kernel(a_ref, w_ref, s_ref, b_ref, o_ref, *, relu):
    acc = jnp.dot(a_ref[...], w_ref[...], preferred_element_type=jnp.float32)
    acc = acc * s_ref[...] + b_ref[...]
    if relu:
        acc = jnp.maximum(acc, 0.0)
    o_ref[...] = acc.astype(o_ref.dtype)


def _mm_bn_res_kernel(a_ref, w_ref, s_ref, b_ref, r_ref, o_ref, *, relu):
    acc = jnp.dot(a_ref[...], w_ref[...], preferred_element_type=jnp.float32)
    acc = acc * s_ref[...] + b_ref[...] + r_ref[...].astype(jnp.float32)
    if relu:
        acc = jnp.maximum(acc, 0.0)
    o_ref[...] = acc.astype(o_ref.dtype)


def _mm_bn_down_kernel(a_ref, w_ref, s_ref, b_ref,
                       xd_ref, wd_ref, ds_ref, db_ref, o_ref, *, relu):
    # main 3x3 conv + BN, plus the 1x1 strided downsample conv + BN (residual
    # branch) fused as a second matmul on the same M tile.
    acc = jnp.dot(a_ref[...], w_ref[...], preferred_element_type=jnp.float32)
    acc = acc * s_ref[...] + b_ref[...]
    res = jnp.dot(xd_ref[...], wd_ref[...], preferred_element_type=jnp.float32)
    acc = acc + (res * ds_ref[...] + db_ref[...])
    if relu:
        acc = jnp.maximum(acc, 0.0)
    o_ref[...] = acc.astype(o_ref.dtype)


def _max_reduce_kernel(x_ref, o_ref):
    # x: (kh*kw, tile_m, C) with -inf padding -> max over window positions
    o_ref[...] = jnp.max(x_ref[...], axis=0)


def _gem_fc_l2_kernel(x_ref, w_ref, b_ref, o_ref, *, p, eps):
    # GeneralizedMeanPooling(p) -> squeeze -> Linear -> F.normalize(p=2,dim=-1)
    x = jnp.maximum(x_ref[...].astype(jnp.float32), eps)
    if p == 3.0:
        xp = x * x * x                      # VPU multiplies, no whole-tensor pow
    else:
        xp = x ** p
    m = jnp.mean(xp, axis=1)                # (N, C)
    g = m ** (1.0 / p)                      # tiny (N, C) pow on the EUP
    y = jnp.dot(g, w_ref[...], preferred_element_type=jnp.float32) + b_ref[...]
    nrm = jnp.sqrt(jnp.sum(y * y, axis=-1, keepdims=True))
    o_ref[...] = y / jnp.maximum(nrm, 1e-12)


# ------------------------------ glue wrappers ------------------------------

def _bn_vec(v, cout):
    return v.reshape(1, cout).astype(jnp.float32)


def matmul_bn(a, w, scale, bias, *, relu=True, residual=None, down=None,
              out_dtype=jnp.bfloat16):
    """out = act( dot(a, w) * scale + bias [+ residual | + fused 1x1 conv+BN] ).

    a: (M, K), w: (K, Cout).  Tiled over M; weights/scale/bias stay resident.
    down: optional (xd (M, Kd), wd (Kd, Cout), dscale, dbias) fused residual.
    """
    m, k = a.shape
    cout = w.shape[1]
    tm = _tile_m(m)
    grid = (pl.cdiv(m, tm),)

    s2 = _bn_vec(scale, cout)
    b2 = _bn_vec(bias, cout)

    a_spec = pl.BlockSpec((tm, k), lambda i: (i, 0))
    w_spec = pl.BlockSpec((k, cout), lambda i: (0, 0))      # resident
    v_spec = pl.BlockSpec((1, cout), lambda i: (0, 0))
    o_spec = pl.BlockSpec((tm, cout), lambda i: (i, 0))

    flops = 2 * m * k * cout
    bytes_accessed = (a.size * a.dtype.itemsize + w.size * w.dtype.itemsize
                      + m * cout * jnp.dtype(out_dtype).itemsize + 2 * cout * 4)

    if residual is not None:
        kern = functools.partial(_mm_bn_res_kernel, relu=relu)
        in_specs = [a_spec, w_spec, v_spec, v_spec,
                    pl.BlockSpec((tm, cout), lambda i: (i, 0))]
        args = (a, w, s2, b2, residual)
        bytes_accessed += residual.size * residual.dtype.itemsize
    elif down is not None:
        xd, wd, dscale, dbias = down
        kd = xd.shape[1]
        kern = functools.partial(_mm_bn_down_kernel, relu=relu)
        in_specs = [a_spec, w_spec, v_spec, v_spec,
                    pl.BlockSpec((tm, kd), lambda i: (i, 0)),
                    pl.BlockSpec((kd, cout), lambda i: (0, 0)),
                    v_spec, v_spec]
        args = (a, w, s2, b2, xd, wd, _bn_vec(dscale, cout), _bn_vec(dbias, cout))
        flops += 2 * m * kd * cout
        bytes_accessed += (xd.size * xd.dtype.itemsize
                           + wd.size * wd.dtype.itemsize + 2 * cout * 4)
    else:
        kern = functools.partial(_mm_bn_kernel, relu=relu)
        in_specs = [a_spec, w_spec, v_spec, v_spec]
        args = (a, w, s2, b2)

    return pl.pallas_call(
        kern,
        out_shape=jax.ShapeDtypeStruct((m, cout), out_dtype),
        grid=grid,
        in_specs=in_specs,
        out_specs=o_spec,
        compiler_params=_compiler(1),
        cost_estimate=pl.CostEstimate(flops=flops, transcendentals=0,
                                      bytes_accessed=bytes_accessed),
    )(*args)


def _im2col(x, kh, kw, stride, pad):
    # x: (N, H, W, C) NHWC -> patches (N*Ho*Wo, kh*kw*C), row order (kh, kw, C)
    n, h, w, c = x.shape
    xp = jnp.pad(x, ((0, 0), (pad, pad), (pad, pad), (0, 0)))
    ho = (h + 2 * pad - kh) // stride + 1
    wo = (w + 2 * pad - kw) // stride + 1
    cols = []
    for i in range(kh):
        for j in range(kw):
            cols.append(xp[:, i:i + stride * ho:stride, j:j + stride * wo:stride, :])
    stacked = jnp.stack(cols, axis=3)               # (N, Ho, Wo, kh*kw, C)
    return stacked.reshape(n * ho * wo, kh * kw * c), (n, ho, wo)


def _pool_patches(x, kh, kw, stride, pad):
    # every window must contain >=1 valid element so the -inf padding can't leak
    assert pad < kh and pad < kw
    n, h, w, c = x.shape
    xp = jnp.pad(x, ((0, 0), (pad, pad), (pad, pad), (0, 0)),
                 constant_values=-jnp.inf)
    ho = (h + 2 * pad - kh) // stride + 1
    wo = (w + 2 * pad - kw) // stride + 1
    cols = []
    for i in range(kh):
        for j in range(kw):
            cols.append(xp[:, i:i + stride * ho:stride, j:j + stride * wo:stride, :])
    stacked = jnp.stack(cols, axis=0)               # (kh*kw, N, Ho, Wo, C)
    return stacked.reshape(kh * kw, n * ho * wo, c), (n, ho, wo)


def conv_bn(x, w_flat, kh, kw, stride, pad, scale, bias, *, relu=True,
            residual=None, down=None):
    patches, (n, ho, wo) = _im2col(x, kh, kw, stride, pad)
    cout = w_flat.shape[1]
    m = n * ho * wo
    res_flat = None if residual is None else residual.reshape(m, cout)
    out = matmul_bn(patches, w_flat, scale, bias, relu=relu,
                    residual=res_flat, down=down)
    return out.reshape(n, ho, wo, cout)


def maxpool_3x3_s2(x):
    patches, (n, ho, wo) = _pool_patches(x, 3, 3, 2, 1)   # (9, M, C)
    c = x.shape[-1]
    m = n * ho * wo
    tm = _tile_m(m)
    out = pl.pallas_call(
        _max_reduce_kernel,
        out_shape=jax.ShapeDtypeStruct((m, c), x.dtype),
        grid=(pl.cdiv(m, tm),),
        in_specs=[pl.BlockSpec((9, tm, c), lambda i: (0, i, 0))],
        out_specs=pl.BlockSpec((tm, c), lambda i: (i, 0)),
        compiler_params=_compiler(1),
    )(patches)
    return out.reshape(n, ho, wo, c)


def gem_fc_l2(x, fc_w, fc_b, *, p=3.0, eps=1e-6):
    # GeM adaptive pooling + squeeze + fc + l2_normalize in one kernel.
    n, h, w, c = x.shape
    xr = x.reshape(n, h * w, c)
    cout = fc_w.shape[1]
    w32 = fc_w.astype(jnp.float32)
    b2 = fc_b.reshape(1, cout).astype(jnp.float32)
    return pl.pallas_call(
        functools.partial(_gem_fc_l2_kernel, p=p, eps=eps),
        out_shape=jax.ShapeDtypeStruct((n, cout), jnp.float32),
        grid=(1,),
        in_specs=[pl.BlockSpec((n, h * w, c), lambda i: (0, 0, 0)),
                  pl.BlockSpec((c, cout), lambda i: (0, 0)),
                  pl.BlockSpec((1, cout), lambda i: (0, 0))],
        out_specs=pl.BlockSpec((n, cout), lambda i: (0, 0)),
        compiler_params=_compiler(1),
    )(xr, w32, b2)


# --------------------------- parameter construction ---------------------------

def _conv_w(key, kh, kw, cin, cout):
    # PyTorch init: normal(0, sqrt(2 / (kh*kw*out_channels)))
    std = math.sqrt(2.0 / (kh * kw * cout))
    w = std * jax.random.normal(key, (kh, kw, cin, cout), jnp.float32)
    return w.reshape(kh * kw * cin, cout).astype(jnp.bfloat16)


def _bn(c, eps=1e-5):
    # BN init: weight=1, bias=0, running_mean=0, running_var=1 (eval-mode fold)
    gamma = jnp.ones((c,), jnp.float32)
    beta = jnp.zeros((c,), jnp.float32)
    mean = jnp.zeros((c,), jnp.float32)
    var = jnp.ones((c,), jnp.float32)
    scale = gamma / jnp.sqrt(var + eps)
    bias = beta - mean * scale
    return scale, bias


def init_params(key, fc_out=128):
    keys = jax.random.split(key, 16)
    p = {"conv1_w": _conv_w(keys[0], 7, 7, 3, 64), "bn1": _bn(64), "layers": []}
    inplanes, ki = 64, 1
    for planes, stride in [(64, 1), (128, 2), (256, 2), (512, 2)]:
        blk = {
            "stride": stride,
            "conv1_w": _conv_w(keys[ki], 3, 3, inplanes, planes),
            "bn1": _bn(planes),
            "conv2_w": _conv_w(keys[ki + 1], 3, 3, planes, planes),
            "bn2": _bn(planes),
        }
        ki += 2
        if stride != 1 or inplanes != planes:        # downsample branch
            blk["down_w"] = _conv_w(keys[ki], 1, 1, inplanes, planes)
            blk["down_bn"] = _bn(planes)
            ki += 1
        p["layers"].append(blk)
        inplanes = planes
    # nn.Linear default init: U(-1/sqrt(fan_in), 1/sqrt(fan_in))
    bound = 1.0 / math.sqrt(512)
    p["fc_w"] = jax.random.uniform(keys[ki], (512, fc_out), jnp.float32, -bound, bound)
    p["fc_b"] = jax.random.uniform(keys[ki + 1], (fc_out,), jnp.float32, -bound, bound)
    return p


# --------------------------------- forward ---------------------------------

def resnet_rmac_forward(params, x_nchw):
    # TODO(synk): BatchNorm uses eval-mode running stats (the module's
    # deterministic init), not training-mode batch statistics.
    # NCHW -> NHWC, bf16 activations (native MXU path); epilogue math in f32.
    x = jnp.transpose(x_nchw, (0, 2, 3, 1)).astype(jnp.bfloat16)
    s, b = params["bn1"]
    x = conv_bn(x, params["conv1_w"], 7, 7, 2, 3, s, b, relu=True)
    x = maxpool_3x3_s2(x)
    for blk in params["layers"]:                                  # BasicBlocks
        stride = blk["stride"]
        s1, b1 = blk["bn1"]
        s2, b2 = blk["bn2"]
        out = conv_bn(x, blk["conv1_w"], 3, 3, stride, 1, s1, b1, relu=True)
        if "down_w" in blk:
            # fuse the 1x1/strided downsample conv + BN into the second conv's
            # kernel instead of round-tripping its result through HBM.
            cin = x.shape[-1]
            xd = x[:, ::stride, ::stride, :].reshape(-1, cin)
            ds, db = blk["down_bn"]
            x = conv_bn(out, blk["conv2_w"], 3, 3, 1, 1, s2, b2, relu=True,
                        down=(xd, blk["down_w"], ds, db))
        else:
            x = conv_bn(out, blk["conv2_w"], 3, 3, 1, 1, s2, b2, relu=True,
                        residual=x)
    # adpool (GeM) + squeeze_ + fc + l2_normalize (dropout_p=None -> no dropout)
    return gem_fc_l2(x, params["fc_w"], params["fc_b"], p=3.0, eps=1e-6)


if __name__ == "__main__":
    key = jax.random.PRNGKey(0)
    pkey, xkey = jax.random.split(key)
    params = init_params(pkey, fc_out=128)
    # PyTorch-style NCHW input (batch=2, 3 channels, 64x64 spatial)
    x = jax.random.normal(xkey, (2, 3, 64, 64), jnp.float32)
    out = resnet_rmac_forward(params, x)
    out = jax.block_until_ready(out)
    assert out.shape == (2, 128)
    assert bool(jnp.all(jnp.isfinite(out)))
    print("KERNEL_OK")
</pallas_src>

<mosaic_0001>
module attributes {stable_mosaic.version = 11 : i64} {
  func.func @_mm_bn_kernel(%arg0: i32, %arg1: memref<512x147xbf16, #tpu.memory_space<vmem>>, %arg2: memref<147x64xbf16, #tpu.memory_space<vmem>>, %arg3: memref<1x64xf32, #tpu.memory_space<vmem>>, %arg4: memref<1x64xf32, #tpu.memory_space<vmem>>, %arg5: memref<512x64xbf16, #tpu.memory_space<vmem>>) attributes {dimension_semantics = [#tpu.dimension_semantics<parallel>], iteration_bounds = array<i64: 4>, scalar_prefetch = 0 : i64, scratch_operands = 0 : i64, tpu.core_type = #tpu.core_type<tc>, window_params = [{transform_indices = @transform_0, window_bounds = array<i64: 512, 147>}, {pipeline_mode = #tpu.pipeline_mode<synchronous>, transform_indices = @transform_1, window_bounds = array<i64: 147, 64>}, {pipeline_mode = #tpu.pipeline_mode<synchronous>, transform_indices = @transform_2, window_bounds = array<i64: 1, 64>}, {pipeline_mode = #tpu.pipeline_mode<synchronous>, transform_indices = @transform_3, window_bounds = array<i64: 1, 64>}, {transform_indices = @transform_4, window_bounds = array<i64: 512, 64>}]} {
    %c0 = arith.constant 0 : index
    %c0_0 = arith.constant 0 : index
    %0 = vector.load %arg1[%c0, %c0_0] : memref<512x147xbf16, #tpu.memory_space<vmem>>, vector<512x147xbf16>
    %c0_1 = arith.constant 0 : index
    %c0_2 = arith.constant 0 : index
    %1 = vector.load %arg2[%c0_1, %c0_2] : memref<147x64xbf16, #tpu.memory_space<vmem>>, vector<147x64xbf16>
    %cst = arith.constant dense<0.000000e+00> : vector<512x64xf32>
    %2 = tpu.matmul %0, %1, %cst {dimension_numbers = #tpu.dot_dimension_numbers<[1], [0], [0], [1], [0, 0, 1, 1], [], []>} : vector<512x147xbf16>, vector<147x64xbf16>, vector<512x64xf32> -> vector<512x64xf32>
    %c0_3 = arith.constant 0 : index
    %c0_4 = arith.constant 0 : index
    %3 = vector.load %arg3[%c0_3, %c0_4] : memref<1x64xf32, #tpu.memory_space<vmem>>, vector<1x64xf32>
    %4 = vector.broadcast %3 : vector<1x64xf32> to vector<512x64xf32>
    %5 = arith.mulf %2, %4 : vector<512x64xf32>
    %c0_5 = arith.constant 0 : index
    %c0_6 = arith.constant 0 : index
    %6 = vector.load %arg4[%c0_5, %c0_6] : memref<1x64xf32, #tpu.memory_space<vmem>>, vector<1x64xf32>
    %7 = vector.broadcast %6 : vector<1x64xf32> to vector<512x64xf32>
    %8 = arith.addf %5, %7 : vector<512x64xf32>
    %cst_7 = arith.constant 0.000000e+00 : f32
    %9 = vector.broadcast %cst_7 : f32 to vector<512x64xf32>
    %10 = arith.maximumf %8, %9 : vector<512x64xf32>
    %11 = arith.truncf %10 : vector<512x64xf32> to vector<512x64xbf16>
    %c0_8 = arith.constant 0 : index
    %c0_9 = arith.constant 0 : index
    %12 = vector.load %arg5[%c0_8, %c0_9] : memref<512x64xbf16, #tpu.memory_space<vmem>>, vector<512x64xbf16>
    tpu.vector_store %arg5[%c0_8, %c0_9], %11 {strides = array<i32>} : memref<512x64xbf16, #tpu.memory_space<vmem>>, vector<512x64xbf16>,
    return
  }
  func.func @transform_0(%arg0: i32) -> (i32, i32) {
    %c0_i32 = arith.constant 0 : i32
    %c0_i32_0 = arith.constant 0 : i32
    return %arg0, %c0_i32 : i32, i32
  }
  func.func @transform_1(%arg0: i32) -> (i32, i32) {
    %c0_i32 = arith.constant 0 : i32
    %c0_i32_0 = arith.constant 0 : i32
    %c0_i32_1 = arith.constant 0 : i32
    return %c0_i32, %c0_i32_0 : i32, i32
  }
  func.func @transform_2(%arg0: i32) -> (i32, i32) {
    %c0_i32 = arith.constant 0 : i32
    %c0_i32_0 = arith.constant 0 : i32
    %c0_i32_1 = arith.constant 0 : i32
    return %c0_i32, %c0_i32_0 : i32, i32
  }
  func.func @transform_3(%arg0: i32) -> (i32, i32) {
    %c0_i32 = arith.constant 0 : i32
    %c0_i32_0 = arith.constant 0 : i32
    %c0_i32_1 = arith.constant 0 : i32
    return %c0_i32, %c0_i32_0 : i32, i32
  }
  func.func @transform_4(%arg0: i32) -> (i32, i32) {
    %c0_i32 = arith.constant 0 : i32
    %c0_i32_0 = arith.constant 0 : i32
    return %arg0, %c0_i32 : i32, i32
  }
}

</mosaic_0001>

<bundles_post_ra>
// kernel: tpu_custom_call.1
= control target key start
LH: loop header
LB: loop body
LE: loop exit
PB: predicated region body
PF: predicated region fallthrough
CT: control target
= control target key end

     0   :  { %s2029_s15 = smov 0   ;;  %s2446_s0 = inlined_call_operand.vmem [shape: bf16[2048,147], index: 0, kind: input, shape index: {}]   ;;  %s2447_s1 = inlined_call_operand.vmem [shape: bf16[147,64], index: 1, kind: input, shape index: {}]   ;;  %s2448_s2 = inlined_call_operand.vmem [shape: f32[1,64], index: 2, kind: input, shape index: {}]   ;;  %s2449_s3 = inlined_call_operand.vmem [shape: f32[1,64], index: 3, kind: input, shape index: {}]   ;;  %s2450_s4 = inlined_call_operand.vmem [shape: bf16[2048,64], index: 4, kind: output, shape index: {}]  }
   0x1 LB: > { %s1609_s16 = sadd.s32 4294967295, %s2000_s15   ;;  %p1613_p0 = scmp.ge.s32.totalorder %s2000_s15, 1  ;;  %s2000_s15 = sphi %s2029_s15, %s14_s15  }
   0x2   : > { %p164_p1 = scmp.lt.s32.totalorder %s2000_s15, 5 }
   0x4   : > { %p165_p2 = pnand %p1613_p0, %p164_p1 }
   0x5   : > { %v1888_v0 = vld [vmem:[%s2447_s1] sm:$0xff] (!%p165_p2)   ;;  %v2002_v1 = vmov (!%p165_p2), 0   ;;  %v1889_v2 = vld [vmem:[%s2447_s1 + $0x8] sm:$0xff] (!%p165_p2)   ;;  %v1890_v3 = vld [vmem:[%s2447_s1 + $0x10] sm:$0xff] (!%p165_p2)   ;;  %s1614_s23 = sshll.u32 (!%p165_p2), %s1609_s16, 6  ;;  %vm633_vm0 = vcmask (!%p165_p2), 154624  }
   0x6   : > { %168 = sbr.rel (%p165_p2) target bundleno = 389 (0x185), region = 36  ;;  %737 = vmatprep.subr.bf16.mxu0 (!%p165_p2), %v2002_v1  ;;  %1858 = vmatprep.subr.bf16.mxu1 (!%p165_p2), %v2002_v1  ;;  %p192_p3 = scmp.lt.s32.totalorder (!%p165_p2), %s1614_s23, 255  ;;  %v1891_v4 = vld [vmem:[%s2447_s1 + $0x18] sm:$0xff] (!%p165_p2)   ;;  %v1892_v5 = vld [vmem:[%s2447_s1 + $0x20] sm:$0xff] (!%p165_p2)   ;;  %v1893_v8 = vld [vmem:[%s2447_s1 + $0x28] sm:$0xff] (!%p165_p2)   ;;  %vm730_vm1 = vcmask (!%p165_p2), 1040384  }
   0x7   : > { %738 = vmatpush1.bf16.msra.mxu0 (!%p165_p2), %v1888_v0  ;;  %1868 = vmatpush1.bf16.msra.mxu1 (!%p165_p2), %v1888_v0  ;;  %v1894_v9 = vld [vmem:[%s2447_s1 + $0x30] sm:$0xff] (!%p165_p2)   ;;  %v1895_v10 = vld [vmem:[%s2447_s1 + $0x38] sm:$0xff] (!%p165_p2)   ;;  %vm731_vm2 = vcmask (!%p165_p2), 1041408   ;;  %v2003_v11 = vmov (!%p165_p2), 65535   ;;  %v1896_v13 = vld [vmem:[%s2447_s1 + $0x40] sm:$0xff] (!%p165_p2)   ;;  %vm1488_vm3 = vcmask (!%p165_p2), 519168  }
   0x8   : > { %739 = vmatprep.subr.bf16.mxu0 (!%p165_p2), %v2002_v1  ;;  %1859 = vmatprep.subr.bf16.mxu1 (!%p165_p2), %v2002_v1  ;;  %v732_v12 = vsel (!%p165_p2), %vm730_vm1, 4294967295, %v2003_v11  ;;  %v1897_v14 = vld [vmem:[%s2447_s1 + $0x48] ss:$0 sps:$4 sm:$0x33] (!%p165_p2)  }
   0x9   : > { %v733_v15 = vsel (!%p165_p2), %vm731_vm2, %v732_v12, 0 }
   0xa   : > { %v735_v16 = vand.u32 (!%p165_p2), %v1897_v14, %v733_v15  ;;  %v2174_v15 = vld [vmem:[%s2448_s2] ss:$0 sm:$0xff] (!%p165_p2) }
   0xb   : > { %740 = vmatpush1.bf16.msra.mxu0 (!%p165_p2), %v1889_v2  ;;  %1869 = vmatpush1.bf16.msra.mxu1 (!%p165_p2), %v1889_v2 }
   0xc   : > { %741 = vmatprep.subr.bf16.mxu0 (!%p165_p2), %v2002_v1  ;;  %1860 = vmatprep.subr.bf16.mxu1 (!%p165_p2), %v2002_v1 }
   0xd   : > { %s2452_s23 = smov (!%p192_p3, %s1614_s23), 255 }
   0xe   : > { %s1793_s26 = sshll.u32 %s2452_s23, 3  ;;  %s1618_s21 = sshll.u32 %s2452_s23, 2 }
   0xf   : > { %742 = vmatpush1.bf16.msra.mxu0 %v1890_v3  ;;  %1870 = vmatpush1.bf16.msra.mxu1 %v1890_v3  ;;  %s2055_s29 = scalar_lea.vmem %s2446_s0, %s1793_s26  ;;  %s2193_s23 = scalar_lea.vmem %s2450_s4, %s1618_s21 }
  0x10   : > { %743 = vmatprep.subr.bf16.mxu0 %v2002_v1  ;;  %1861 = vmatprep.subr.bf16.mxu1 %v2002_v1  ;;  %v1900_v6 = vld [vmem:[%s2055_s29 + $0x4] ss:$8 sps:$4 sm:$0xff]   ;;  %v1898_v17 = vld [vmem:[%s2055_s29] ss:$8 sps:$4 sm:$0xff]   ;;  %v1904_v19 = vld [vmem:[%s2055_s29 + $0x14] ss:$8 sps:$4 sm:$0xff]  }
  0x11   : > { %v1903_v7 = vld [vmem:[%s2055_s29 + $0x104] ss:$8 sps:$4 sm:$0xff]   ;;  %1693 = vmatprep.mubr.msk.bf16.mxu0 %vm633_vm0, %v1900_v6  ;;  %v1901_v18 = vld [vmem:[%s2055_s29 + $0x100] ss:$8 sps:$4 sm:$0xff]   ;;  %v1906_v20 = vld [vmem:[%s2055_s29 + $0x114] ss:$8 sps:$4 sm:$0xff]  }
  0x12   : > { %1709 = vmatprep.mubr.msk.bf16.mxu1 %vm633_vm0, %v1903_v7  ;;  %v1908_v21 = vld [vmem:[%s2055_s29 + $0x10] ss:$8 sps:$4 sm:$0xff]   ;;  %v1910_v23 = vld [vmem:[%s2055_s29 + $0x24] ss:$8 sps:$4 sm:$0xff]   ;;  %v1914_v25 = vld [vmem:[%s2055_s29 + $0x20] ss:$8 sps:$4 sm:$0xff]  }
  0x13   : > { %744 = vmatpush1.bf16.msra.mxu0 %v1891_v4  ;;  %1871 = vmatpush1.bf16.msra.mxu1 %v1891_v4  ;;  %v1909_v22 = vld [vmem:[%s2055_s29 + $0x110] ss:$8 sps:$4 sm:$0xff]   ;;  %v1912_v24 = vld [vmem:[%s2055_s29 + $0x124] ss:$8 sps:$4 sm:$0xff]   ;;  %v1915_v26 = vld [vmem:[%s2055_s29 + $0x120] ss:$8 sps:$4 sm:$0xff]  }
  0x14   : > { %745 = vmatprep.subr.bf16.mxu0 %v2002_v1  ;;  %1862 = vmatprep.subr.bf16.mxu1 %v2002_v1  ;;  %v1916_v27 = vld [vmem:[%s2055_s29 + $0x34] ss:$8 sps:$4 sm:$0xff]   ;;  %v1920_v29 = vld [vmem:[%s2055_s29 + $0x30] ss:$8 sps:$4 sm:$0xff]   ;;  %v1922_v31 = vld [vmem:[%s2055_s29 + $0x44] ss:$8 sps:$4 sm:$0xff]  }
  0x15   : > { %v1918_v28 = vld [vmem:[%s2055_s29 + $0x134] ss:$8 sps:$4 sm:$0xff]   ;;  %v1921_v30 = vld [vmem:[%s2055_s29 + $0x130] ss:$8 sps:$4 sm:$0xff]   ;;  %v1924_v32 = vld [vmem:[%s2055_s29 + $0x144] ss:$8 sps:$4 sm:$0xff]  }
  0x16   : > { %v1926_v33 = vld [vmem:[%s2055_s29 + $0x40] ss:$8 sps:$4 sm:$0xff]   ;;  %v1928_v35 = vld [vmem:[%s2055_s29 + $0x54] ss:$8 sps:$4 sm:$0xff]   ;;  %v1932_v37 = vld [vmem:[%s2055_s29 + $0x50] ss:$8 sps:$4 sm:$0xff]  }
  0x17   : > { %746 = vmatpush1.bf16.msra.mxu0 %v1892_v5  ;;  %1872 = vmatpush1.bf16.msra.mxu1 %v1892_v5  ;;  %v1927_v34 = vld [vmem:[%s2055_s29 + $0x140] ss:$8 sps:$4 sm:$0xff]   ;;  %v1930_v36 = vld [vmem:[%s2055_s29 + $0x154] ss:$8 sps:$4 sm:$0xff]   ;;  %v1933_v38 = vld [vmem:[%s2055_s29 + $0x150] ss:$8 sps:$4 sm:$0xff]  }
  0x18   : > { %747 = vmatprep.subr.bf16.mxu0 %v2002_v1  ;;  %1863 = vmatprep.subr.bf16.mxu1 %v2002_v1  ;;  %v1934_v39 = vld [vmem:[%s2055_s29 + $0x64] ss:$8 sps:$4 sm:$0xff]   ;;  %v1938_v41 = vld [vmem:[%s2055_s29 + $0x60] ss:$8 sps:$4 sm:$0xff]   ;;  %v1940_v43 = vld [vmem:[%s2055_s29 + $0x74] ss:$8 sps:$4 sm:$0xff]  }
  0x19   : > { %v1936_v40 = vld [vmem:[%s2055_s29 + $0x164] ss:$8 sps:$4 sm:$0xff]   ;;  %v1939_v42 = vld [vmem:[%s2055_s29 + $0x160] ss:$8 sps:$4 sm:$0xff]   ;;  %v1942_v44 = vld [vmem:[%s2055_s29 + $0x174] ss:$8 sps:$4 sm:$0xff]  }
  0x1a   : > { %v1944_v45 = vld [vmem:[%s2055_s29 + $0x70] ss:$8 sps:$4 sm:$0xff]   ;;  %v1946_v47 = vld [vmem:[%s2055_s29 + $0x84] ss:$8 sps:$4 sm:$0xff]   ;;  %v1950_v49 = vld [vmem:[%s2055_s29 + $0x80] ss:$8 sps:$4 sm:$0xff]  }
  0x1b   : > { %748 = vmatpush1.bf16.msra.mxu0 %v1893_v8  ;;  %1873 = vmatpush1.bf16.msra.mxu1 %v1893_v8  ;;  %v1945_v46 = vld [vmem:[%s2055_s29 + $0x170] ss:$8 sps:$4 sm:$0xff]   ;;  %v1948_v48 = vld [vmem:[%s2055_s29 + $0x184] ss:$8 sps:$4 sm:$0xff]   ;;  %v1951_v50 = vld [vmem:[%s2055_s29 + $0x180] ss:$8 sps:$4 sm:$0xff]  }
  0x1c   : > { %749 = vmatprep.subr.bf16.mxu0 %v2002_v1  ;;  %1864 = vmatprep.subr.bf16.mxu1 %v2002_v1  ;;  %v1952_v51 = vld [vmem:[%s2055_s29 + $0x94] ss:$8 sps:$4 sm:$0xff]   ;;  %v1956_v53 = vld [vmem:[%s2055_s29 + $0x90] ss:$8 sps:$4 sm:$0xff]   ;;  %v1958_v55 = vld [vmem:[%s2055_s29 + $0xa4] ss:$8 sps:$4 sm:$0xff]  }
  0x1d   : > { %v1954_v52 = vld [vmem:[%s2055_s29 + $0x194] ss:$8 sps:$4 sm:$0xff]   ;;  %v1957_v54 = vld [vmem:[%s2055_s29 + $0x190] ss:$8 sps:$4 sm:$0xff]   ;;  %v1960_v56 = vld [vmem:[%s2055_s29 + $0x1a4] ss:$8 sps:$4 sm:$0xff]  }
  0x1e   : > { %v1962_v57 = vld [vmem:[%s2055_s29 + $0xa0] ss:$8 sps:$4 sm:$0xff]   ;;  %v1964_v59 = vld [vmem:[%s2055_s29 + $0xb4] ss:$8 sps:$4 sm:$0xff]   ;;  %v1968_v61 = vld [vmem:[%s2055_s29 + $0xb0] ss:$8 sps:$4 sm:$0xff]  }
  0x1f   : > { %750 = vmatpush1.bf16.msra.mxu0 %v1894_v9  ;;  %1874 = vmatpush1.bf16.msra.mxu1 %v1894_v9  ;;  %v1963_v58 = vld [vmem:[%s2055_s29 + $0x1a0] ss:$8 sps:$4 sm:$0xff]   ;;  %v1966_v60 = vld [vmem:[%s2055_s29 + $0x1b4] ss:$8 sps:$4 sm:$0xff]   ;;  %v1969_v62 = vld [vmem:[%s2055_s29 + $0x1b0] ss:$8 sps:$4 sm:$0xff]  }
  0x20   : > { %751 = vmatprep.subr.bf16.mxu0 %v2002_v1  ;;  %1865 = vmatprep.subr.bf16.mxu1 %v2002_v1  ;;  %v1970_v63 = vld [vmem:[%s2055_s29 + $0xc4] ss:$8 sps:$4 sm:$0xff]   ;;  %v1975_v2 = vld [vmem:[%s2055_s29 + $0x1c0] ss:$8 sps:$4 sm:$0xff]   ;;  %v1976_v3 = vld [vmem:[%s2055_s29 + $0xd4] ss:$8 sps:$4 sm:$0xff]  }
  0x21   : > { %v1972_v0 = vld [vmem:[%s2055_s29 + $0x1c4] ss:$8 sps:$4 sm:$0xff]   ;;  %v1978_v4 = vld [vmem:[%s2055_s29 + $0x1d4] ss:$8 sps:$4 sm:$0xff]   ;;  %v1980_v5 = vld [vmem:[%s2055_s29 + $0xd0] ss:$8 sps:$4 sm:$0xff]  }
  0x22   : > { %v1981_v6 = vld [vmem:[%s2055_s29 + $0x1d0] ss:$8 sps:$4 sm:$0xff]   ;;  %v1982_v7 = vld [vmem:[%s2055_s29 + $0xe4] ss:$8 sps:$4 sm:$0xff]   ;;  %v1986_v9 = vld [vmem:[%s2055_s29 + $0xe0] ss:$8 sps:$4 sm:$0xff]  }
  0x23   : > { %752 = vmatpush1.bf16.msra.mxu0 %v1895_v10  ;;  %1875 = vmatpush1.bf16.msra.mxu1 %v1895_v10  ;;  %v1984_v8 = vld [vmem:[%s2055_s29 + $0x1e4] ss:$8 sps:$4 sm:$0xff]   ;;  %v1987_v10 = vld [vmem:[%s2055_s29 + $0x1e0] ss:$8 sps:$4 sm:$0xff]   ;;  %v1988_v11 = vld [vmem:[%s2055_s29 + $0xf4] ss:$8 sps:$4 sm:$0xff]  }
  0x24   : > { %753 = vmatprep.subr.bf16.mxu0 %v2002_v1  ;;  %1866 = vmatprep.subr.bf16.mxu1 %v2002_v1  ;;  %v1990_v12 = vld [vmem:[%s2055_s29 + $0x1f4] ss:$8 sps:$4 sm:$0xff]   ;;  %v1993_v14 = vld [vmem:[%s2055_s29 + $0x1f0] ss:$8 sps:$4 sm:$0xff]  }
  0x27   : > { %754 = vmatpush1.bf16.msra.mxu0 %v1896_v13  ;;  %1876 = vmatpush1.bf16.msra.mxu1 %v1896_v13  ;;  %v1992_v13 = vld [vmem:[%s2055_s29 + $0xf0] ss:$8 sps:$4 sm:$0xff]  }
  0x28   : > { %755 = vmatprep.subr.bf16.mxu0 %v2002_v1  ;;  %1867 = vmatprep.subr.bf16.mxu1 %v2002_v1  ;;  %v1974_v1 = vld [vmem:[%s2055_s29 + $0xc0] ss:$8 sps:$4 sm:$0xff]  }
  0x2b   : > { %756 = vmatpush1.bf16.msra.mxu0 %v735_v16  ;;  %1877 = vmatpush1.bf16.msra.mxu1 %v735_v16 }
  0x2e   : > { %770 = vmatmul.mubr.bf16.vlgmr.msra.gmra.mrb[0].mxu0 %v1898_v17  ;;  %898 = vmatmul.mubr.bf16.vlgmr.msra.gmra.mrb[0].mxu1 %v1901_v18  ;;  %v2179_v17 = vld [vmem:[%s2449_s3] ss:$0 sm:$0xff] }
  0x2f   : > { %1694 = vmatprep.mubr.msk.bf16.mxu0 %vm633_vm0, %v1904_v19  ;;  %1710 = vmatprep.mubr.msk.bf16.mxu1 %vm633_vm0, %v1906_v20 }
  0x36   : > { %778 = vmatmul.mubr.bf16.gmra.mrb[4].mxu0 %v1908_v21  ;;  %906 = vmatmul.mubr.bf16.gmra.mrb[4].mxu1 %v1909_v22 }
  0x37   : > { %1695 = vmatprep.mubr.msk.bf16.mxu0 %vm633_vm0, %v1910_v23  ;;  %1711 = vmatprep.mubr.msk.bf16.mxu1 %vm633_vm0, %v1912_v24 }
  0x3e   : > { %786 = vmatmul.mubr.bf16.gmra.mrb[8].mxu0 %v1914_v25  ;;  %914 = vmatmul.mubr.bf16.gmra.mrb[8].mxu1 %v1915_v26 }
  0x3f   : > { %1696 = vmatprep.mubr.msk.bf16.mxu0 %vm633_vm0, %v1916_v27  ;;  %1712 = vmatprep.mubr.msk.bf16.mxu1 %vm633_vm0, %v1918_v28 }
  0x46   : > { %794 = vmatmul.mubr.bf16.gmra.mrb[12].mxu0 %v1920_v29  ;;  %922 = vmatmul.mubr.bf16.gmra.mrb[12].mxu1 %v1921_v30 }
  0x47   : > { %1697 = vmatprep.mubr.msk.bf16.mxu0 %vm633_vm0, %v1922_v31  ;;  %1713 = vmatprep.mubr.msk.bf16.mxu1 %vm633_vm0, %v1924_v32 }
  0x4e   : > { %802 = vmatmul.mubr.bf16.gmra.mrb[16].mxu0 %v1926_v33  ;;  %930 = vmatmul.mubr.bf16.gmra.mrb[16].mxu1 %v1927_v34 }
  0x4f   : > { %1698 = vmatprep.mubr.msk.bf16.mxu0 %vm633_vm0, %v1928_v35  ;;  %1714 = vmatprep.mubr.msk.bf16.mxu1 %vm633_vm0, %v1930_v36 }
  0x56   : > { %810 = vmatmul.mubr.bf16.gmra.mrb[20].mxu0 %v1932_v37  ;;  %938 = vmatmul.mubr.bf16.gmra.mrb[20].mxu1 %v1933_v38 }
  0x57   : > { %1699 = vmatprep.mubr.msk.bf16.mxu0 %vm633_vm0, %v1934_v39  ;;  %1715 = vmatprep.mubr.msk.bf16.mxu1 %vm633_vm0, %v1936_v40 }
  0x5e   : > { %818 = vmatmul.mubr.bf16.gmra.mrb[24].mxu0 %v1938_v41  ;;  %946 = vmatmul.mubr.bf16.gmra.mrb[24].mxu1 %v1939_v42 }
  0x5f   : > { %1700 = vmatprep.mubr.msk.bf16.mxu0 %vm633_vm0, %v1940_v43  ;;  %1716 = vmatprep.mubr.msk.bf16.mxu1 %vm633_vm0, %v1942_v44 }
  0x66   : > { %826 = vmatmul.mubr.bf16.gmra.mrb[28].mxu0 %v1944_v45  ;;  %954 = vmatmul.mubr.bf16.gmra.mrb[28].mxu1 %v1945_v46 }
  0x67   : > { %1701 = vmatprep.mubr.msk.bf16.mxu0 %vm633_vm0, %v1946_v47  ;;  %1717 = vmatprep.mubr.msk.bf16.mxu1 %vm633_vm0, %v1948_v48 }
  0x6e   : > { %834 = vmatmul.mubr.bf16.gmra.mrb[32].mxu0 %v1950_v49  ;;  %962 = vmatmul.mubr.bf16.gmra.mrb[32].mxu1 %v1951_v50 }
  0x6f   : > { %1702 = vmatprep.mubr.msk.bf16.mxu0 %vm633_vm0, %v1952_v51  ;;  %1718 = vmatprep.mubr.msk.bf16.mxu1 %vm633_vm0, %v1954_v52 }
  0x76   : > { %842 = vmatmul.mubr.bf16.gmra.mrb[36].mxu0 %v1956_v53  ;;  %970 = vmatmul.mubr.bf16.gmra.mrb[36].mxu1 %v1957_v54 }
  0x77   : > { %1703 = vmatprep.mubr.msk.bf16.mxu0 %vm633_vm0, %v1958_v55  ;;  %1719 = vmatprep.mubr.msk.bf16.mxu1 %vm633_vm0, %v1960_v56 }
  0x7e   : > { %850 = vmatmul.mubr.bf16.gmra.mrb[40].mxu0 %v1962_v57  ;;  %978 = vmatmul.mubr.bf16.gmra.mrb[40].mxu1 %v1963_v58 }
  0x7f   : > { %1704 = vmatprep.mubr.msk.bf16.mxu0 %vm633_vm0, %v1964_v59  ;;  %1720 = vmatprep.mubr.msk.bf16.mxu1 %vm633_vm0, %v1966_v60 }
  0x86   : > { %858 = vmatmul.mubr.bf16.gmra.mrb[44].mxu0 %v1968_v61  ;;  %986 = vmatmul.mubr.bf16.gmra.mrb[44].mxu1 %v1969_v62 }
  0x87   : > { %1705 = vmatprep.mubr.msk.bf16.mxu0 %vm633_vm0, %v1970_v63  ;;  %1721 = vmatprep.mubr.msk.bf16.mxu1 %vm633_vm0, %v1972_v0 }
  0x8e   : > { %866 = vmatmul.mubr.bf16.gmra.mrb[48].mxu0 %v1974_v1  ;;  %994 = vmatmul.mubr.bf16.gmra.mrb[48].mxu1 %v1975_v2 }
  0x8f   : > { %1706 = vmatprep.mubr.msk.bf16.mxu0 %vm633_vm0, %v1976_v3  ;;  %1722 = vmatprep.mubr.msk.bf16.mxu1 %vm633_vm0, %v1978_v4 }
  0x96   : > { %874 = vmatmul.mubr.bf16.gmra.mrb[52].mxu0 %v1980_v5  ;;  %1002 = vmatmul.mubr.bf16.gmra.mrb[52].mxu1 %v1981_v6 }
  0x97   : > { %1707 = vmatprep.mubr.msk.bf16.mxu0 %vm633_vm0, %v1982_v7  ;;  %1723 = vmatprep.mubr.msk.bf16.mxu1 %vm633_vm0, %v1984_v8 }
  0x9e   : > { %882 = vmatmul.mubr.bf16.gmra.mrb[56].mxu0 %v1986_v9  ;;  %1010 = vmatmul.mubr.bf16.gmra.mrb[56].mxu1 %v1987_v10 }
  0x9f   : > { %1708 = vmatprep.mubr.msk.bf16.mxu0 %vm633_vm0, %v1988_v11  ;;  %1724 = vmatprep.mubr.msk.bf16.mxu1 %vm633_vm0, %v1990_v12 }
  0xa6   : > { %890 = vmatmul.mubr.bf16.gmra.mrb[60].mxu0 %v1992_v13  ;;  %1018 = vmatmul.mubr.bf16.gmra.mrb[60].mxu1 %v1993_v14 }
 0x101   : > { %v771_v16 = vpop.f32.mrb[0].mxu0  ;;  %v899_v18 = vpop.f32.mrb[0].mxu1 }
 0x102   : > { %v1033_v19 = vmul.f32 %v2174_v15, %v771_v16  ;;  %v1065_v20 = vmul.f32 %v2174_v15, %v899_v18  ;;  %v773_v21 = vpop.f32.mrb[1].mxu0  ;;  %v901_v22 = vpop.f32.mrb[1].mxu1 }
 0x103   : > { %v774_v23 = vpop.f32.mrb[2].mxu0  ;;  %v902_v24 = vpop.f32.mrb[2].mxu1 }
 0x104   : > { %v1104_v25 = vadd.f32 %v2179_v17, %v1033_v19  ;;  %v1136_v26 = vadd.f32 %v2179_v17, %v1065_v20  ;;  %v1034_v27 = vmul.f32 %v2174_v15, %v774_v23  ;;  %v1066_v28 = vmul.f32 %v2174_v15, %v902_v24  ;;  %v776_v29 = vpop.f32.mrb[3].mxu0  ;;  %v904_v30 = vpop.f32.mrb[3].mxu1 }
 0x106   : > { %v1168_v31 = vmax.f32 %v1104_v25, 0.0  ;;  %v1200_v32 = vmax.f32 %v1136_v26, 0.0  ;;  %v1105_v33 = vadd.f32 %v2179_v17, %v1034_v27  ;;  %v1137_v34 = vadd.f32 %v2179_v17, %v1066_v28 }
 0x108   : > { %v1794_v35 = vpack.c.bf16 %v1168_v31, %v1168_v31  ;;  %v1826_v36 = vpack.c.bf16 %v1200_v32, %v1200_v32  ;;  %v1169_v37 = vmax.f32 %v1105_v33, 0.0  ;;  %v1201_v38 = vmax.f32 %v1137_v34, 0.0 }
 0x109   : > { %v779_v39 = vpop.f32.mrb[4].mxu0  ;;  %v907_v40 = vpop.f32.mrb[4].mxu1 }
 0x10a   : > { %1489 = vst.msk [vmem:[%s2193_s23] sm:$0xf] %vm1488_vm3, %v1794_v35  ;;  %1521 = vst.msk [vmem:[%s2193_s23 + $0x80] sm:$0xf] %vm1488_vm3, %v1826_v36  ;;  %v1795_v41 = vpack.c.bf16 %v1169_v37, %v1169_v37  ;;  %v1827_v42 = vpack.c.bf16 %v1201_v38, %v1201_v38  ;;  %v1035_v43 = vmul.f32 %v2174_v15, %v779_v39  ;;  %v781_v45 = vpop.f32.mrb[5].mxu0  ;;  %v909_v46 = vpop.f32.mrb[5].mxu1 }
 0x10b   : > { %v1067_v44 = vmul.f32 %v2174_v15, %v907_v40  ;;  %v782_v47 = vpop.f32.mrb[6].mxu0  ;;  %v910_v48 = vpop.f32.mrb[6].mxu1 }
 0x10c   : > { %1490 = vst.msk [vmem:[%s2193_s23 + $0x4] sm:$0xf] %vm1488_vm3, %v1795_v41  ;;  %1522 = vst.msk [vmem:[%s2193_s23 + $0x84] sm:$0xf] %vm1488_vm3, %v1827_v42  ;;  %v1106_v49 = vadd.f32 %v2179_v17, %v1035_v43  ;;  %v1036_v51 = vmul.f32 %v2174_v15, %v782_v47  ;;  %v1068_v52 = vmul.f32 %v2174_v15, %v910_v48  ;;  %v784_v53 = vpop.f32.mrb[7].mxu0  ;;  %v912_v54 = vpop.f32.mrb[7].mxu1 }
 0x10d   : > { %v1138_v50 = vadd.f32 %v2179_v17, %v1067_v44 }
 0x10e   : > { %v1170_v55 = vmax.f32 %v1106_v49, 0.0  ;;  %v1107_v57 = vadd.f32 %v2179_v17, %v1036_v51  ;;  %v1139_v58 = vadd.f32 %v2179_v17, %v1068_v52 }
 0x10f   : > { %v1202_v56 = vmax.f32 %v1138_v50, 0.0 }
 0x110   : > { %v1796_v59 = vpack.c.bf16 %v1170_v55, %v1170_v55  ;;  %v1171_v61 = vmax.f32 %v1107_v57, 0.0  ;;  %v1203_v62 = vmax.f32 %v1139_v58, 0.0 }
 0x111   : > { %v1828_v60 = vpack.c.bf16 %v1202_v56, %v1202_v56  ;;  %v787_v63 = vpop.f32.mrb[8].mxu0  ;;  %v915_v0 = vpop.f32.mrb[8].mxu1 }
 0x112   : > { %1491 = vst.msk [vmem:[%s2193_s23 + $0x8] sm:$0xf] %vm1488_vm3, %v1796_v59  ;;  %v1797_v1 = vpack.c.bf16 %v1171_v61, %v1171_v61  ;;  %v1829_v2 = vpack.c.bf16 %v1203_v62, %v1203_v62  ;;  %v1037_v3 = vmul.f32 %v2174_v15, %v787_v63  ;;  %v1069_v4 = vmul.f32 %v2174_v15, %v915_v0  ;;  %v789_v5 = vpop.f32.mrb[9].mxu0  ;;  %v917_v6 = vpop.f32.mrb[9].mxu1 }
 0x113   : > { %1523 = vst.msk [vmem:[%s2193_s23 + $0x88] sm:$0xf] %vm1488_vm3, %v1828_v60  ;;  %v790_v7 = vpop.f32.mrb[10].mxu0  ;;  %v918_v8 = vpop.f32.mrb[10].mxu1 }
 0x114   : > { %1492 = vst.msk [vmem:[%s2193_s23 + $0xc] sm:$0xf] %vm1488_vm3, %v1797_v1  ;;  %1524 = vst.msk [vmem:[%s2193_s23 + $0x8c] sm:$0xf] %vm1488_vm3, %v1829_v2  ;;  %v1108_v9 = vadd.f32 %v2179_v17, %v1037_v3  ;;  %v1140_v10 = vadd.f32 %v2179_v17, %v1069_v4  ;;  %v1038_v11 = vmul.f32 %v2174_v15, %v790_v7  ;;  %v792_v13 = vpop.f32.mrb[11].mxu0  ;;  %v920_v14 = vpop.f32.mrb[11].mxu1 }
 0x115   : > { %v1070_v12 = vmul.f32 %v2174_v15, %v918_v8 }
 0x116   : > { %v1172_v16 = vmax.f32 %v1108_v9, 0.0  ;;  %v1204_v18 = vmax.f32 %v1140_v10, 0.0  ;;  %v1109_v19 = vadd.f32 %v2179_v17, %v1038_v11 }
 0x117   : > { %v1141_v20 = vadd.f32 %v2179_v17, %v1070_v12 }
 0x118   : > { %v1798_v21 = vpack.c.bf16 %v1172_v16, %v1172_v16  ;;  %v1830_v22 = vpack.c.bf16 %v1204_v18, %v1204_v18  ;;  %v1173_v23 = vmax.f32 %v1109_v19, 0.0 }
 0x119   : > { %v1205_v24 = vmax.f32 %v1141_v20, 0.0  ;;  %v795_v25 = vpop.f32.mrb[12].mxu0  ;;  %v923_v26 = vpop.f32.mrb[12].mxu1 }
 0x11a   : > { %1493 = vst.msk [vmem:[%s2193_s23 + $0x10] sm:$0xf] %vm1488_vm3, %v1798_v21  ;;  %1525 = vst.msk [vmem:[%s2193_s23 + $0x90] sm:$0xf] %vm1488_vm3, %v1830_v22  ;;  %v1799_v27 = vpack.c.bf16 %v1173_v23, %v1173_v23  ;;  %v1039_v29 = vmul.f32 %v2174_v15, %v795_v25  ;;  %v1071_v30 = vmul.f32 %v2174_v15, %v923_v26  ;;  %v797_v31 = vpop.f32.mrb[13].mxu0  ;;  %v925_v32 = vpop.f32.mrb[13].mxu1 }
 0x11b   : > { %v1831_v28 = vpack.c.bf16 %v1205_v24, %v1205_v24  ;;  %v798_v33 = vpop.f32.mrb[14].mxu0  ;;  %v926_v34 = vpop.f32.mrb[14].mxu1 }
 0x11c   : > { %1494 = vst.msk [vmem:[%s2193_s23 + $0x14] sm:$0xf] %vm1488_vm3, %v1799_v27  ;;  %v1110_v35 = vadd.f32 %v2179_v17, %v1039_v29  ;;  %v1142_v36 = vadd.f32 %v2179_v17, %v1071_v30  ;;  %v1040_v37 = vmul.f32 %v2174_v15, %v798_v33  ;;  %v1072_v38 = vmul.f32 %v2174_v15, %v926_v34  ;;  %v800_v39 = vpop.f32.mrb[15].mxu0  ;;  %v928_v40 = vpop.f32.mrb[15].mxu1 }
 0x11d   : > { %1526 = vst.msk [vmem:[%s2193_s23 + $0x94] sm:$0xf] %vm1488_vm3, %v1831_v28 }
 0x11e   : > { %v1174_v41 = vmax.f32 %v1110_v35, 0.0  ;;  %v1206_v42 = vmax.f32 %v1142_v36, 0.0  ;;  %v1111_v43 = vadd.f32 %v2179_v17, %v1040_v37  ;;  %v1143_v44 = vadd.f32 %v2179_v17, %v1072_v38 }
 0x120   : > { %v1800_v45 = vpack.c.bf16 %v1174_v41, %v1174_v41  ;;  %v1832_v46 = vpack.c.bf16 %v1206_v42, %v1206_v42  ;;  %v1175_v47 = vmax.f32 %v1111_v43, 0.0  ;;  %v1207_v48 = vmax.f32 %v1143_v44, 0.0 }
 0x121   : > { %v803_v49 = vpop.f32.mrb[16].mxu0  ;;  %v931_v50 = vpop.f32.mrb[16].mxu1 }
 0x122   : > { %1495 = vst.msk [vmem:[%s2193_s23 + $0x18] sm:$0xf] %vm1488_vm3, %v1800_v45  ;;  %1527 = vst.msk [vmem:[%s2193_s23 + $0x98] sm:$0xf] %vm1488_vm3, %v1832_v46  ;;  %v1801_v51 = vpack.c.bf16 %v1175_v47, %v1175_v47  ;;  %v1833_v52 = vpack.c.bf16 %v1207_v48, %v1207_v48  ;;  %v1041_v53 = vmul.f32 %v2174_v15, %v803_v49  ;;  %v805_v55 = vpop.f32.mrb[17].mxu0  ;;  %v933_v56 = vpop.f32.mrb[17].mxu1 }
 0x123   : > { %v1073_v54 = vmul.f32 %v2174_v15, %v931_v50  ;;  %v806_v57 = vpop.f32.mrb[18].mxu0  ;;  %v934_v58 = vpop.f32.mrb[18].mxu1 }
 0x124   : > { %1496 = vst.msk [vmem:[%s2193_s23 + $0x1c] sm:$0xf] %vm1488_vm3, %v1801_v51  ;;  %1528 = vst.msk [vmem:[%s2193_s23 + $0x9c] sm:$0xf] %vm1488_vm3, %v1833_v52  ;;  %v1112_v59 = vadd.f32 %v2179_v17, %v1041_v53  ;;  %v1042_v61 = vmul.f32 %v2174_v15, %v806_v57  ;;  %v1074_v62 = vmul.f32 %v2174_v15, %v934_v58  ;;  %v808_v63 = vpop.f32.mrb[19].mxu0  ;;  %v936_v0 = vpop.f32.mrb[19].mxu1 }
 0x125   : > { %v1144_v60 = vadd.f32 %v2179_v17, %v1073_v54 }
 0x126   : > { %v1176_v1 = vmax.f32 %v1112_v59, 0.0  ;;  %v1113_v3 = vadd.f32 %v2179_v17, %v1042_v61  ;;  %v1145_v4 = vadd.f32 %v2179_v17, %v1074_v62 }
 0x127   : > { %v1208_v2 = vmax.f32 %v1144_v60, 0.0 }
 0x128   : > { %v1802_v5 = vpack.c.bf16 %v1176_v1, %v1176_v1  ;;  %v1177_v7 = vmax.f32 %v1113_v3, 0.0  ;;  %v1209_v8 = vmax.f32 %v1145_v4, 0.0 }
 0x129   : > { %v1834_v6 = vpack.c.bf16 %v1208_v2, %v1208_v2  ;;  %v811_v9 = vpop.f32.mrb[20].mxu0  ;;  %v939_v10 = vpop.f32.mrb[20].mxu1 }
 0x12a   : > { %1497 = vst.msk [vmem:[%s2193_s23 + $0x20] sm:$0xf] %vm1488_vm3, %v1802_v5  ;;  %v1803_v11 = vpack.c.bf16 %v1177_v7, %v1177_v7  ;;  %v1835_v12 = vpack.c.bf16 %v1209_v8, %v1209_v8  ;;  %v1043_v13 = vmul.f32 %v2174_v15, %v811_v9  ;;  %v1075_v14 = vmul.f32 %v2174_v15, %v939_v10  ;;  %v813_v16 = vpop.f32.mrb[21].mxu0  ;;  %v941_v18 = vpop.f32.mrb[21].mxu1 }
 0x12b   : > { %1529 = vst.msk [vmem:[%s2193_s23 + $0xa0] sm:$0xf] %vm1488_vm3, %v1834_v6  ;;  %v814_v19 = vpop.f32.mrb[22].mxu0  ;;  %v942_v20 = vpop.f32.mrb[22].mxu1 }
 0x12c   : > { %1498 = vst.msk [vmem:[%s2193_s23 + $0x24] sm:$0xf] %vm1488_vm3, %v1803_v11  ;;  %1530 = vst.msk [vmem:[%s2193_s23 + $0xa4] sm:$0xf] %vm1488_vm3, %v1835_v12  ;;  %v1114_v21 = vadd.f32 %v2179_v17, %v1043_v13  ;;  %v1146_v22 = vadd.f32 %v2179_v17, %v1075_v14  ;;  %v1044_v23 = vmul.f32 %v2174_v15, %v814_v19  ;;  %v816_v25 = vpop.f32.mrb[23].mxu0  ;;  %v944_v26 = vpop.f32.mrb[23].mxu1 }
 0x12d   : > { %v1076_v24 = vmul.f32 %v2174_v15, %v942_v20 }
 0x12e   : > { %v1178_v27 = vmax.f32 %v1114_v21, 0.0  ;;  %v1210_v28 = vmax.f32 %v1146_v22, 0.0  ;;  %v1115_v29 = vadd.f32 %v2179_v17, %v1044_v23 }
 0x12f   : > { %v1147_v30 = vadd.f32 %v2179_v17, %v1076_v24 }
 0x130   : > { %v1804_v31 = vpack.c.bf16 %v1178_v27, %v1178_v27  ;;  %v1836_v32 = vpack.c.bf16 %v1210_v28, %v1210_v28  ;;  %v1179_v33 = vmax.f32 %v1115_v29, 0.0 }
 0x131   : > { %v1211_v34 = vmax.f32 %v1147_v30, 0.0  ;;  %v819_v35 = vpop.f32.mrb[24].mxu0  ;;  %v947_v36 = vpop.f32.mrb[24].mxu1 }
 0x132   : > { %1499 = vst.msk [vmem:[%s2193_s23 + $0x28] sm:$0xf] %vm1488_vm3, %v1804_v31  ;;  %1531 = vst.msk [vmem:[%s2193_s23 + $0xa8] sm:$0xf] %vm1488_vm3, %v1836_v32  ;;  %v1805_v37 = vpack.c.bf16 %v1179_v33, %v1179_v33  ;;  %v1045_v39 = vmul.f32 %v2174_v15, %v819_v35  ;;  %v1077_v40 = vmul.f32 %v2174_v15, %v947_v36  ;;  %v821_v41 = vpop.f32.mrb[25].mxu0  ;;  %v949_v42 = vpop.f32.mrb[25].mxu1 }
 0x133   : > { %v1837_v38 = vpack.c.bf16 %v1211_v34, %v1211_v34  ;;  %v822_v43 = vpop.f32.mrb[26].mxu0  ;;  %v950_v44 = vpop.f32.mrb[26].mxu1 }
 0x134   : > { %1500 = vst.msk [vmem:[%s2193_s23 + $0x2c] sm:$0xf] %vm1488_vm3, %v1805_v37  ;;  %v1116_v45 = vadd.f32 %v2179_v17, %v1045_v39  ;;  %v1148_v46 = vadd.f32 %v2179_v17, %v1077_v40  ;;  %v1046_v47 = vmul.f32 %v2174_v15, %v822_v43  ;;  %v1078_v48 = vmul.f32 %v2174_v15, %v950_v44  ;;  %v824_v49 = vpop.f32.mrb[27].mxu0  ;;  %v952_v50 = vpop.f32.mrb[27].mxu1 }
 0x135   : > { %1532 = vst.msk [vmem:[%s2193_s23 + $0xac] sm:$0xf] %vm1488_vm3, %v1837_v38 }
 0x136   : > { %v1180_v51 = vmax.f32 %v1116_v45, 0.0  ;;  %v1212_v52 = vmax.f32 %v1148_v46, 0.0  ;;  %v1117_v53 = vadd.f32 %v2179_v17, %v1046_v47  ;;  %v1149_v54 = vadd.f32 %v2179_v17, %v1078_v48 }
 0x138   : > { %v1806_v55 = vpack.c.bf16 %v1180_v51, %v1180_v51  ;;  %v1838_v56 = vpack.c.bf16 %v1212_v52, %v1212_v52  ;;  %v1181_v57 = vmax.f32 %v1117_v53, 0.0  ;;  %v1213_v58 = vmax.f32 %v1149_v54, 0.0 }
 0x139   : > { %v827_v59 = vpop.f32.mrb[28].mxu0  ;;  %v955_v60 = vpop.f32.mrb[28].mxu1 }
 0x13a   : > { %1501 = vst.msk [vmem:[%s2193_s23 + $0x30] sm:$0xf] %vm1488_vm3, %v1806_v55  ;;  %1533 = vst.msk [vmem:[%s2193_s23 + $0xb0] sm:$0xf] %vm1488_vm3, %v1838_v56  ;;  %v1807_v61 = vpack.c.bf16 %v1181_v57, %v1181_v57  ;;  %v1839_v62 = vpack.c.bf16 %v1213_v58, %v1213_v58  ;;  %v1047_v63 = vmul.f32 %v2174_v15, %v827_v59  ;;  %v829_v1 = vpop.f32.mrb[29].mxu0  ;;  %v957_v2 = vpop.f32.mrb[29].mxu1 }
 0x13b   : > { %v1079_v0 = vmul.f32 %v2174_v15, %v955_v60  ;;  %v830_v3 = vpop.f32.mrb[30].mxu0  ;;  %v958_v4 = vpop.f32.mrb[30].mxu1 }
 0x13c   : > { %1502 = vst.msk [vmem:[%s2193_s23 + $0x34] sm:$0xf] %vm1488_vm3, %v1807_v61  ;;  %1534 = vst.msk [vmem:[%s2193_s23 + $0xb4] sm:$0xf] %vm1488_vm3, %v1839_v62  ;;  %v1118_v5 = vadd.f32 %v2179_v17, %v1047_v63  ;;  %v1048_v7 = vmul.f32 %v2174_v15, %v830_v3  ;;  %v1080_v8 = vmul.f32 %v2174_v15, %v958_v4  ;;  %v832_v9 = vpop.f32.mrb[31].mxu0  ;;  %v960_v10 = vpop.f32.mrb[31].mxu1 }
 0x13d   : > { %v1150_v6 = vadd.f32 %v2179_v17, %v1079_v0 }
 0x13e   : > { %v1182_v11 = vmax.f32 %v1118_v5, 0.0  ;;  %v1119_v13 = vadd.f32 %v2179_v17, %v1048_v7  ;;  %v1151_v14 = vadd.f32 %v2179_v17, %v1080_v8 }
 0x13f   : > { %v1214_v12 = vmax.f32 %v1150_v6, 0.0 }
 0x140   : > { %v1808_v16 = vpack.c.bf16 %v1182_v11, %v1182_v11  ;;  %v1183_v19 = vmax.f32 %v1119_v13, 0.0  ;;  %v1215_v20 = vmax.f32 %v1151_v14, 0.0 }
 0x141   : > { %v1840_v18 = vpack.c.bf16 %v1214_v12, %v1214_v12  ;;  %v835_v21 = vpop.f32.mrb[32].mxu0  ;;  %v963_v22 = vpop.f32.mrb[32].mxu1 }
 0x142   : > { %1503 = vst.msk [vmem:[%s2193_s23 + $0x38] sm:$0xf] %vm1488_vm3, %v1808_v16  ;;  %v1809_v23 = vpack.c.bf16 %v1183_v19, %v1183_v19  ;;  %v1841_v24 = vpack.c.bf16 %v1215_v20, %v1215_v20  ;;  %v1049_v25 = vmul.f32 %v2174_v15, %v835_v21  ;;  %v1081_v26 = vmul.f32 %v2174_v15, %v963_v22  ;;  %v837_v27 = vpop.f32.mrb[33].mxu0  ;;  %v965_v28 = vpop.f32.mrb[33].mxu1 }
 0x143   : > { %1535 = vst.msk [vmem:[%s2193_s23 + $0xb8] sm:$0xf] %vm1488_vm3, %v1840_v18  ;;  %v838_v29 = vpop.f32.mrb[34].mxu0  ;;  %v966_v30 = vpop.f32.mrb[34].mxu1 }
 0x144   : > { %1504 = vst.msk [vmem:[%s2193_s23 + $0x3c] sm:$0xf] %vm1488_vm3, %v1809_v23  ;;  %1536 = vst.msk [vmem:[%s2193_s23 + $0xbc] sm:$0xf] %vm1488_vm3, %v1841_v24  ;;  %v1120_v31 = vadd.f32 %v2179_v17, %v1049_v25  ;;  %v1152_v32 = vadd.f32 %v2179_v17, %v1081_v26  ;;  %v1050_v33 = vmul.f32 %v2174_v15, %v838_v29  ;;  %v840_v35 = vpop.f32.mrb[35].mxu0  ;;  %v968_v36 = vpop.f32.mrb[35].mxu1 }
 0x145   : > { %v1082_v34 = vmul.f32 %v2174_v15, %v966_v30 }
 0x146   : > { %v1184_v37 = vmax.f32 %v1120_v31, 0.0  ;;  %v1216_v38 = vmax.f32 %v1152_v32, 0.0  ;;  %v1121_v39 = vadd.f32 %v2179_v17, %v1050_v33 }
 0x147   : > { %v1153_v40 = vadd.f32 %v2179_v17, %v1082_v34 }
 0x148   : > { %v1810_v41 = vpack.c.bf16 %v1184_v37, %v1184_v37  ;;  %v1842_v42 = vpack.c.bf16 %v1216_v38, %v1216_v38  ;;  %v1185_v43 = vmax.f32 %v1121_v39, 0.0 }
 0x149   : > { %v1217_v44 = vmax.f32 %v1153_v40, 0.0  ;;  %v843_v45 = vpop.f32.mrb[36].mxu0  ;;  %v971_v46 = vpop.f32.mrb[36].mxu1 }
 0x14a   : > { %1505 = vst.msk [vmem:[%s2193_s23 + $0x40] sm:$0xf] %vm1488_vm3, %v1810_v41  ;;  %1537 = vst.msk [vmem:[%s2193_s23 + $0xc0] sm:$0xf] %vm1488_vm3, %v1842_v42  ;;  %v1811_v47 = vpack.c.bf16 %v1185_v43, %v1185_v43  ;;  %v1051_v49 = vmul.f32 %v2174_v15, %v843_v45  ;;  %v1083_v50 = vmul.f32 %v2174_v15, %v971_v46  ;;  %v845_v51 = vpop.f32.mrb[37].mxu0  ;;  %v973_v52 = vpop.f32.mrb[37].mxu1 }
 0x14b   : > { %v1843_v48 = vpack.c.bf16 %v1217_v44, %v1217_v44  ;;  %v846_v53 = vpop.f32.mrb[38].mxu0  ;;  %v974_v54 = vpop.f32.mrb[38].mxu1 }
 0x14c   : > { %1506 = vst.msk [vmem:[%s2193_s23 + $0x44] sm:$0xf] %vm1488_vm3, %v1811_v47  ;;  %v1122_v55 = vadd.f32 %v2179_v17, %v1051_v49  ;;  %v1154_v56 = vadd.f32 %v2179_v17, %v1083_v50  ;;  %v1052_v57 = vmul.f32 %v2174_v15, %v846_v53  ;;  %v1084_v58 = vmul.f32 %v2174_v15, %v974_v54  ;;  %v848_v59 = vpop.f32.mrb[39].mxu0  ;;  %v976_v60 = vpop.f32.mrb[39].mxu1 }
 0x14d   : > { %1538 = vst.msk [vmem:[%s2193_s23 + $0xc4] sm:$0xf] %vm1488_vm3, %v1843_v48 }
 0x14e   : > { %v1186_v61 = vmax.f32 %v1122_v55, 0.0  ;;  %v1218_v62 = vmax.f32 %v1154_v56, 0.0  ;;  %v1123_v63 = vadd.f32 %v2179_v17, %v1052_v57  ;;  %v1155_v0 = vadd.f32 %v2179_v17, %v1084_v58 }
 0x150   : > { %v1812_v1 = vpack.c.bf16 %v1186_v61, %v1186_v61  ;;  %v1844_v2 = vpack.c.bf16 %v1218_v62, %v1218_v62  ;;  %v1187_v3 = vmax.f32 %v1123_v63, 0.0  ;;  %v1219_v4 = vmax.f32 %v1155_v0, 0.0 }
 0x151   : > { %v851_v5 = vpop.f32.mrb[40].mxu0  ;;  %v979_v6 = vpop.f32.mrb[40].mxu1 }
 0x152   : > { %1507 = vst.msk [vmem:[%s2193_s23 + $0x48] sm:$0xf] %vm1488_vm3, %v1812_v1  ;;  %1539 = vst.msk [vmem:[%s2193_s23 + $0xc8] sm:$0xf] %vm1488_vm3, %v1844_v2  ;;  %v1813_v7 = vpack.c.bf16 %v1187_v3, %v1187_v3  ;;  %v1845_v8 = vpack.c.bf16 %v1219_v4, %v1219_v4  ;;  %v1053_v9 = vmul.f32 %v2174_v15, %v851_v5  ;;  %v853_v11 = vpop.f32.mrb[41].mxu0  ;;  %v981_v12 = vpop.f32.mrb[41].mxu1 }
 0x153   : > { %v1085_v10 = vmul.f32 %v2174_v15, %v979_v6  ;;  %v854_v13 = vpop.f32.mrb[42].mxu0  ;;  %v982_v14 = vpop.f32.mrb[42].mxu1 }
 0x154   : > { %1508 = vst.msk [vmem:[%s2193_s23 + $0x4c] sm:$0xf] %vm1488_vm3, %v1813_v7  ;;  %1540 = vst.msk [vmem:[%s2193_s23 + $0xcc] sm:$0xf] %vm1488_vm3, %v1845_v8  ;;  %v1124_v16 = vadd.f32 %v2179_v17, %v1053_v9  ;;  %v1054_v19 = vmul.f32 %v2174_v15, %v854_v13  ;;  %v1086_v20 = vmul.f32 %v2174_v15, %v982_v14  ;;  %v856_v21 = vpop.f32.mrb[43].mxu0  ;;  %v984_v22 = vpop.f32.mrb[43].mxu1 }
 0x155   : > { %v1156_v18 = vadd.f32 %v2179_v17, %v1085_v10 }
 0x156   : > { %v1188_v23 = vmax.f32 %v1124_v16, 0.0  ;;  %v1125_v25 = vadd.f32 %v2179_v17, %v1054_v19  ;;  %v1157_v26 = vadd.f32 %v2179_v17, %v1086_v20 }
 0x157   : > { %v1220_v24 = vmax.f32 %v1156_v18, 0.0 }
 0x158   : > { %v1814_v27 = vpack.c.bf16 %v1188_v23, %v1188_v23  ;;  %v1189_v29 = vmax.f32 %v1125_v25, 0.0  ;;  %v1221_v30 = vmax.f32 %v1157_v26, 0.0 }
 0x159   : > { %v1846_v28 = vpack.c.bf16 %v1220_v24, %v1220_v24  ;;  %v859_v31 = vpop.f32.mrb[44].mxu0  ;;  %v987_v32 = vpop.f32.mrb[44].mxu1 }
 0x15a   : > { %1509 = vst.msk [vmem:[%s2193_s23 + $0x50] sm:$0xf] %vm1488_vm3, %v1814_v27  ;;  %v1815_v33 = vpack.c.bf16 %v1189_v29, %v1189_v29  ;;  %v1847_v34 = vpack.c.bf16 %v1221_v30, %v1221_v30  ;;  %v1055_v35 = vmul.f32 %v2174_v15, %v859_v31  ;;  %v1087_v36 = vmul.f32 %v2174_v15, %v987_v32  ;;  %v861_v37 = vpop.f32.mrb[45].mxu0  ;;  %v989_v38 = vpop.f32.mrb[45].mxu1 }
 0x15b   : > { %1541 = vst.msk [vmem:[%s2193_s23 + $0xd0] sm:$0xf] %vm1488_vm3, %v1846_v28  ;;  %v862_v39 = vpop.f32.mrb[46].mxu0  ;;  %v990_v40 = vpop.f32.mrb[46].mxu1 }
 0x15c   : > { %1510 = vst.msk [vmem:[%s2193_s23 + $0x54] sm:$0xf] %vm1488_vm3, %v1815_v33  ;;  %1542 = vst.msk [vmem:[%s2193_s23 + $0xd4] sm:$0xf] %vm1488_vm3, %v1847_v34  ;;  %v1126_v41 = vadd.f32 %v2179_v17, %v1055_v35  ;;  %v1158_v42 = vadd.f32 %v2179_v17, %v1087_v36  ;;  %v1056_v43 = vmul.f32 %v2174_v15, %v862_v39  ;;  %v864_v45 = vpop.f32.mrb[47].mxu0  ;;  %v992_v46 = vpop.f32.mrb[47].mxu1 }
 0x15d   : > { %v1088_v44 = vmul.f32 %v2174_v15, %v990_v40 }
 0x15e   : > { %v1190_v47 = vmax.f32 %v1126_v41, 0.0  ;;  %v1222_v48 = vmax.f32 %v1158_v42, 0.0  ;;  %v1127_v49 = vadd.f32 %v2179_v17, %v1056_v43 }
 0x15f   : > { %v1159_v50 = vadd.f32 %v2179_v17, %v1088_v44 }
 0x160   : > { %v1816_v51 = vpack.c.bf16 %v1190_v47, %v1190_v47  ;;  %v1848_v52 = vpack.c.bf16 %v1222_v48, %v1222_v48  ;;  %v1191_v53 = vmax.f32 %v1127_v49, 0.0 }
 0x161   : > { %v1223_v54 = vmax.f32 %v1159_v50, 0.0  ;;  %v867_v55 = vpop.f32.mrb[48].mxu0  ;;  %v995_v56 = vpop.f32.mrb[48].mxu1 }
 0x162   : > { %1511 = vst.msk [vmem:[%s2193_s23 + $0x58] sm:$0xf] %vm1488_vm3, %v1816_v51  ;;  %1543 = vst.msk [vmem:[%s2193_s23 + $0xd8] sm:$0xf] %vm1488_vm3, %v1848_v52  ;;  %v1817_v57 = vpack.c.bf16 %v1191_v53, %v1191_v53  ;;  %v1057_v59 = vmul.f32 %v2174_v15, %v867_v55  ;;  %v1089_v60 = vmul.f32 %v2174_v15, %v995_v56  ;;  %v869_v61 = vpop.f32.mrb[49].mxu0  ;;  %v997_v62 = vpop.f32.mrb[49].mxu1 }
 0x163   : > { %v1849_v58 = vpack.c.bf16 %v1223_v54, %v1223_v54  ;;  %v870_v63 = vpop.f32.mrb[50].mxu0  ;;  %v998_v0 = vpop.f32.mrb[50].mxu1 }
 0x164   : > { %1512 = vst.msk [vmem:[%s2193_s23 + $0x5c] sm:$0xf] %vm1488_vm3, %v1817_v57  ;;  %v1128_v1 = vadd.f32 %v2179_v17, %v1057_v59  ;;  %v1160_v2 = vadd.f32 %v2179_v17, %v1089_v60  ;;  %v1058_v3 = vmul.f32 %v2174_v15, %v870_v63  ;;  %v1090_v4 = vmul.f32 %v2174_v15, %v998_v0  ;;  %v872_v5 = vpop.f32.mrb[51].mxu0  ;;  %v1000_v6 = vpop.f32.mrb[51].mxu1 }
 0x165   : > { %1544 = vst.msk [vmem:[%s2193_s23 + $0xdc] sm:$0xf] %vm1488_vm3, %v1849_v58 }
 0x166   : > { %v1192_v7 = vmax.f32 %v1128_v1, 0.0  ;;  %v1224_v8 = vmax.f32 %v1160_v2, 0.0  ;;  %v1129_v9 = vadd.f32 %v2179_v17, %v1058_v3  ;;  %v1161_v10 = vadd.f32 %v2179_v17, %v1090_v4 }
 0x168   : > { %v1818_v11 = vpack.c.bf16 %v1192_v7, %v1192_v7  ;;  %v1850_v12 = vpack.c.bf16 %v1224_v8, %v1224_v8  ;;  %v1193_v13 = vmax.f32 %v1129_v9, 0.0  ;;  %v1225_v14 = vmax.f32 %v1161_v10, 0.0 }
 0x169   : > { %v875_v16 = vpop.f32.mrb[52].mxu0  ;;  %v1003_v18 = vpop.f32.mrb[52].mxu1 }
 0x16a   : > { %1513 = vst.msk [vmem:[%s2193_s23 + $0x60] sm:$0xf] %vm1488_vm3, %v1818_v11  ;;  %1545 = vst.msk [vmem:[%s2193_s23 + $0xe0] sm:$0xf] %vm1488_vm3, %v1850_v12  ;;  %v1819_v19 = vpack.c.bf16 %v1193_v13, %v1193_v13  ;;  %v1851_v20 = vpack.c.bf16 %v1225_v14, %v1225_v14  ;;  %v1059_v21 = vmul.f32 %v2174_v15, %v875_v16  ;;  %v877_v23 = vpop.f32.mrb[53].mxu0  ;;  %v1005_v24 = vpop.f32.mrb[53].mxu1 }
 0x16b   : > { %v1091_v22 = vmul.f32 %v2174_v15, %v1003_v18  ;;  %v878_v25 = vpop.f32.mrb[54].mxu0  ;;  %v1006_v26 = vpop.f32.mrb[54].mxu1 }
 0x16c   : > { %1514 = vst.msk [vmem:[%s2193_s23 + $0x64] sm:$0xf] %vm1488_vm3, %v1819_v19  ;;  %1546 = vst.msk [vmem:[%s2193_s23 + $0xe4] sm:$0xf] %vm1488_vm3, %v1851_v20  ;;  %v1130_v27 = vadd.f32 %v2179_v17, %v1059_v21  ;;  %v1060_v29 = vmul.f32 %v2174_v15, %v878_v25  ;;  %v1092_v30 = vmul.f32 %v2174_v15, %v1006_v26  ;;  %v880_v31 = vpop.f32.mrb[55].mxu0  ;;  %v1008_v32 = vpop.f32.mrb[55].mxu1 }
 0x16d   : > { %v1162_v28 = vadd.f32 %v2179_v17, %v1091_v22 }
 0x16e   : > { %v1194_v33 = vmax.f32 %v1130_v27, 0.0  ;;  %v1131_v35 = vadd.f32 %v2179_v17, %v1060_v29  ;;  %v1163_v36 = vadd.f32 %v2179_v17, %v1092_v30 }
 0x16f   : > { %v1226_v34 = vmax.f32 %v1162_v28, 0.0 }
 0x170   : > { %v1820_v37 = vpack.c.bf16 %v1194_v33, %v1194_v33  ;;  %v1195_v39 = vmax.f32 %v1131_v35, 0.0  ;;  %v1227_v40 = vmax.f32 %v1163_v36, 0.0 }
 0x171   : > { %v1852_v38 = vpack.c.bf16 %v1226_v34, %v1226_v34  ;;  %v883_v41 = vpop.f32.mrb[56].mxu0  ;;  %v1011_v42 = vpop.f32.mrb[56].mxu1 }
 0x172   : > { %1515 = vst.msk [vmem:[%s2193_s23 + $0x68] sm:$0xf] %vm1488_vm3, %v1820_v37  ;;  %v1821_v43 = vpack.c.bf16 %v1195_v39, %v1195_v39  ;;  %v1853_v44 = vpack.c.bf16 %v1227_v40, %v1227_v40  ;;  %v1061_v45 = vmul.f32 %v2174_v15, %v883_v41  ;;  %v1093_v46 = vmul.f32 %v2174_v15, %v1011_v42  ;;  %v885_v47 = vpop.f32.mrb[57].mxu0  ;;  %v1013_v48 = vpop.f32.mrb[57].mxu1 }
 0x173   : > { %1547 = vst.msk [vmem:[%s2193_s23 + $0xe8] sm:$0xf] %vm1488_vm3, %v1852_v38  ;;  %v886_v49 = vpop.f32.mrb[58].mxu0  ;;  %v1014_v50 = vpop.f32.mrb[58].mxu1 }
 0x174   : > { %1516 = vst.msk [vmem:[%s2193_s23 + $0x6c] sm:$0xf] %vm1488_vm3, %v1821_v43  ;;  %1548 = vst.msk [vmem:[%s2193_s23 + $0xec] sm:$0xf] %vm1488_vm3, %v1853_v44  ;;  %v1132_v51 = vadd.f32 %v2179_v17, %v1061_v45  ;;  %v1164_v52 = vadd.f32 %v2179_v17, %v1093_v46  ;;  %v1062_v53 = vmul.f32 %v2174_v15, %v886_v49  ;;  %v888_v55 = vpop.f32.mrb[59].mxu0  ;;  %v1016_v56 = vpop.f32.mrb[59].mxu1 }
 0x175   : > { %v1094_v54 = vmul.f32 %v2174_v15, %v1014_v50 }
 0x176   : > { %v1196_v57 = vmax.f32 %v1132_v51, 0.0  ;;  %v1228_v58 = vmax.f32 %v1164_v52, 0.0  ;;  %v1133_v59 = vadd.f32 %v2179_v17, %v1062_v53 }
 0x177   : > { %v1165_v60 = vadd.f32 %v2179_v17, %v1094_v54 }
 0x178   : > { %v1822_v61 = vpack.c.bf16 %v1196_v57, %v1196_v57  ;;  %v1854_v62 = vpack.c.bf16 %v1228_v58, %v1228_v58  ;;  %v1197_v63 = vmax.f32 %v1133_v59, 0.0 }
 0x179   : > { %v1229_v0 = vmax.f32 %v1165_v60, 0.0  ;;  %v891_v1 = vpop.f32.mrb[60].mxu0  ;;  %v1019_v2 = vpop.f32.mrb[60].mxu1 }
 0x17a   : > { %1517 = vst.msk [vmem:[%s2193_s23 + $0x70] sm:$0xf] %vm1488_vm3, %v1822_v61  ;;  %1549 = vst.msk [vmem:[%s2193_s23 + $0xf0] sm:$0xf] %vm1488_vm3, %v1854_v62  ;;  %v1823_v3 = vpack.c.bf16 %v1197_v63, %v1197_v63  ;;  %v1063_v5 = vmul.f32 %v2174_v15, %v891_v1  ;;  %v1095_v6 = vmul.f32 %v2174_v15, %v1019_v2  ;;  %v893_v7 = vpop.f32.mrb[61].mxu0  ;;  %v1021_v8 = vpop.f32.mrb[61].mxu1 }
 0x17b   : > { %v1855_v4 = vpack.c.bf16 %v1229_v0, %v1229_v0  ;;  %v894_v9 = vpop.f32.mrb[62].mxu0  ;;  %v1022_v10 = vpop.f32.mrb[62].mxu1 }
 0x17c   : > { %1518 = vst.msk [vmem:[%s2193_s23 + $0x74] sm:$0xf] %vm1488_vm3, %v1823_v3  ;;  %v1134_v11 = vadd.f32 %v2179_v17, %v1063_v5  ;;  %v1166_v12 = vadd.f32 %v2179_v17, %v1095_v6  ;;  %v1064_v13 = vmul.f32 %v2174_v15, %v894_v9  ;;  %v1096_v14 = vmul.f32 %v2174_v15, %v1022_v10  ;;  %v896_v16 = vpop.f32.mrb[63].mxu0  ;;  %v1024_v18 = vpop.f32.mrb[63].mxu1 }
 0x17d   : > { %1550 = vst.msk [vmem:[%s2193_s23 + $0xf4] sm:$0xf] %vm1488_vm3, %v1855_v4 }
 0x17e   : > { %v1198_v19 = vmax.f32 %v1134_v11, 0.0  ;;  %v1230_v20 = vmax.f32 %v1166_v12, 0.0  ;;  %v1135_v21 = vadd.f32 %v2179_v17, %v1064_v13  ;;  %v1167_v22 = vadd.f32 %v2179_v17, %v1096_v14 }
 0x180   : > { %v1824_v23 = vpack.c.bf16 %v1198_v19, %v1198_v19  ;;  %v1856_v24 = vpack.c.bf16 %v1230_v20, %v1230_v20  ;;  %v1199_v25 = vmax.f32 %v1135_v21, 0.0  ;;  %v1231_v26 = vmax.f32 %v1167_v22, 0.0 }
 0x182   : > { %1519 = vst.msk [vmem:[%s2193_s23 + $0x78] sm:$0xf] %vm1488_vm3, %v1824_v23  ;;  %1551 = vst.msk [vmem:[%s2193_s23 + $0xf8] sm:$0xf] %vm1488_vm3, %v1856_v24  ;;  %v1825_v27 = vpack.c.bf16 %v1199_v25, %v1199_v25  ;;  %v1857_v28 = vpack.c.bf16 %v1231_v26, %v1231_v26 }
 0x184   : > { %1520 = vst.msk [vmem:[%s2193_s23 + $0x7c] sm:$0xf] %vm1488_vm3, %v1825_v27  ;;  %1552 = vst.msk [vmem:[%s2193_s23 + $0xfc] sm:$0xf] %vm1488_vm3, %v1857_v28 }
 0x185 PF: > { %s14_s15 = sadd.s32 1, %s2000_s15  }
 0x186   : > { %p11_p4 = scmp.ge.s32.totalorder %s14_s15, 6  }
 0x188   :  { %13 = sbr.rel (!%p11_p4) target bundleno = 1 (0x1), region = 66 }

</bundles_post_ra>
